<compile_context>
chip_gen: v6e
topology: v6e:2x2x1
jax: 0.10.0
libtpu: 0.0.40
codegen_flags: <defaults>
</compile_context>

<pallas_src>
import math

import jax
import jax.numpy as jnp
from jax import lax
from jax.experimental import pallas as pl
from jax.experimental.pallas import tpu as pltpu

# config (consistent with the module: N_EMBD % N_HEAD == 0, T <= block_size)
B, T, C = 2, 8, 32
N_HEAD = 4
DH = C // N_HEAD


# ---------------------------------------------------------------------------
# Fused kernel: c_attn -> per-head causal SDPA -> (head-merge + c_proj)
# ---------------------------------------------------------------------------
def make_fused_kernel(batch, seq, embd, n_head):
    dh = embd // n_head
    scale = 1.0 / math.sqrt(dh)

    def kernel(x_ref, wa_ref, ba_ref, wp_ref, bp_ref, o_ref):
        # x_ref : (B*T, C)   wa_ref: (C, 3C)  ba_ref: (1, 3C)
        # wp_ref: (C, C)     bp_ref: (1, C)   o_ref : (B*T, C)
        x = x_ref[...]
        wa = wa_ref[...]
        wp = wp_ref[...]
        bp = bp_ref[...]

        # c_attn: one lane-dense MXU matmul producing q|k|v for all rows.
        qkv = jnp.dot(x, wa, preferred_element_type=jnp.float32) + ba_ref[...]

        # causal mask, hoisted out of the (b, h) loops
        row = lax.broadcasted_iota(jnp.int32, (seq, seq), 0)
        col = lax.broadcasted_iota(jnp.int32, (seq, seq), 1)
        causal = col <= row

        for b in range(batch):              # unrolled: single grid step
            r0 = b * seq
            acc = jnp.zeros((seq, embd), jnp.float32)
            for h in range(n_head):         # unrolled: heads sliced from slab
                c0 = h * dh
                # fold 1/sqrt(dh) into q (T*dh elems) instead of scores (T*T)
                q = qkv[r0:r0 + seq, c0:c0 + dh] * scale
                k = qkv[r0:r0 + seq, embd + c0:embd + c0 + dh]
                v = qkv[r0:r0 + seq, 2 * embd + c0:2 * embd + c0 + dh]

                # q @ k^T without materializing a transpose of k
                s = lax.dot_general(
                    q, k, (((1,), (1,)), ((), ())),
                    preferred_element_type=jnp.float32,
                )  # (T, T)
                s = jnp.where(causal, s, -jnp.inf)

                # numerically-stable softmax; reciprocal goes to the EUP slot
                m = jnp.max(s, axis=-1, keepdims=True)
                p = jnp.exp(s - m)
                p = p * pl.reciprocal(
                    jnp.sum(p, axis=-1, keepdims=True), approx=True
                )

                y_h = jnp.dot(p, v, preferred_element_type=jnp.float32)  # (T, dh)
                # fused head-merge + c_proj:  y @ Wp == sum_h y_h @ Wp[h-slice]
                acc = acc + jnp.dot(
                    y_h, wp[c0:c0 + dh, :], preferred_element_type=jnp.float32
                )

            # full-lane-width, sublane-aligned store of this batch's rows
            o_ref[r0:r0 + seq, :] = acc + bp

    return kernel


# ---------------------------------------------------------------------------
# Module forward
# ---------------------------------------------------------------------------
def causal_self_attention(x, w_attn, b_attn, w_proj, b_proj):
    """x: (B, T, C). Weights follow PyTorch Linear convention: W is (out, in)."""
    Bx, Tx, Cx = x.shape
    BT = Bx * Tx
    kernel = make_fused_kernel(Bx, Tx, Cx, N_HEAD)

    out2d = pl.pallas_call(
        kernel,
        out_shape=jax.ShapeDtypeStruct((BT, Cx), jnp.float32),
        grid=(1,),
        in_specs=[
            pl.BlockSpec((BT, Cx), lambda i: (0, 0)),        # x slab
            pl.BlockSpec((Cx, 3 * Cx), lambda i: (0, 0)),    # W_attn^T
            pl.BlockSpec((1, 3 * Cx), lambda i: (0, 0)),     # b_attn
            pl.BlockSpec((Cx, Cx), lambda i: (0, 0)),        # W_proj^T
            pl.BlockSpec((1, Cx), lambda i: (0, 0)),         # b_proj
        ],
        out_specs=pl.BlockSpec((BT, Cx), lambda i: (0, 0)),
        compiler_params=pltpu.CompilerParams(
            dimension_semantics=("arbitrary",)
        ),
    )(
        x.reshape(BT, Cx),
        w_attn.T,                       # (C, 3C)
        b_attn.reshape(1, 3 * Cx),
        w_proj.T,                       # (C, C)
        b_proj.reshape(1, Cx),
    )
    return out2d.reshape(Bx, Tx, Cx)


# ---------------------------------------------------------------------------
# Pure-JAX reference for verification
# ---------------------------------------------------------------------------
def reference(x, w_attn, b_attn, w_proj, b_proj):
    Bx, Tx, Cx = x.shape
    qkv = x @ w_attn.T + b_attn
    q, k, v = jnp.split(qkv, 3, axis=2)

    def to_heads(t):
        return t.reshape(Bx, Tx, N_HEAD, DH).transpose(0, 2, 1, 3)

    q, k, v = to_heads(q), to_heads(k), to_heads(v)
    s = jnp.einsum("bhqd,bhkd->bhqk", q, k) / math.sqrt(DH)
    mask = jnp.tril(jnp.ones((Tx, Tx), dtype=bool))
    s = jnp.where(mask[None, None], s, -jnp.inf)
    p = jax.nn.softmax(s, axis=-1)
    y = jnp.einsum("bhqk,bhkd->bhqd", p, v)
    y = y.transpose(0, 2, 1, 3).reshape(Bx, Tx, Cx)
    return y @ w_proj.T + b_proj


if __name__ == "__main__":
    key = jax.random.PRNGKey(0)
    kx, k1, k2, k3, k4 = jax.random.split(key, 5)

    x = jax.random.normal(kx, (B, T, C), dtype=jnp.float32)

    # deterministic synthetic parameters (PyTorch Linear shapes: W is (out, in))
    w_attn = 0.02 * jax.random.normal(k1, (3 * C, C), dtype=jnp.float32)
    b_attn = 0.02 * jax.random.normal(k2, (3 * C,), dtype=jnp.float32)
    w_proj = 0.02 * jax.random.normal(k3, (C, C), dtype=jnp.float32)
    b_proj = 0.02 * jax.random.normal(k4, (C,), dtype=jnp.float32)

    out = causal_self_attention(x, w_attn, b_attn, w_proj, b_proj)
    out = jax.block_until_ready(out)

    ref = reference(x, w_attn, b_attn, w_proj, b_proj)
    assert out.shape == (B, T, C)
    # tolerance relaxed slightly vs 1e-5: approx=True reciprocal on the EUP
    assert jnp.allclose(out, ref, atol=1e-3, rtol=1e-3), "mismatch vs reference"

    print("KERNEL_OK")
</pallas_src>

<mosaic_0001>
module attributes {stable_mosaic.version = 11 : i64} {
  func.func @kernel(%arg0: i32, %arg1: memref<16x32xf32, #tpu.memory_space<vmem>>, %arg2: memref<32x96xf32, #tpu.memory_space<vmem>>, %arg3: memref<1x96xf32, #tpu.memory_space<vmem>>, %arg4: memref<32x32xf32, #tpu.memory_space<vmem>>, %arg5: memref<1x32xf32, #tpu.memory_space<vmem>>, %arg6: memref<16x32xf32, #tpu.memory_space<vmem>>) attributes {dimension_semantics = [#tpu.dimension_semantics<arbitrary>], iteration_bounds = array<i64: 1>, scalar_prefetch = 0 : i64, scratch_operands = 0 : i64, tpu.core_type = #tpu.core_type<tc>, window_params = [{pipeline_mode = #tpu.pipeline_mode<synchronous>, transform_indices = @transform_0, window_bounds = array<i64: 16, 32>}, {pipeline_mode = #tpu.pipeline_mode<synchronous>, transform_indices = @transform_1, window_bounds = array<i64: 32, 96>}, {pipeline_mode = #tpu.pipeline_mode<synchronous>, transform_indices = @transform_2, window_bounds = array<i64: 1, 96>}, {pipeline_mode = #tpu.pipeline_mode<synchronous>, transform_indices = @transform_3, window_bounds = array<i64: 32, 32>}, {pipeline_mode = #tpu.pipeline_mode<synchronous>, transform_indices = @transform_4, window_bounds = array<i64: 1, 32>}, {pipeline_mode = #tpu.pipeline_mode<synchronous>, transform_indices = @transform_5, window_bounds = array<i64: 16, 32>}]} {
    %c0 = arith.constant 0 : index
    %c0_0 = arith.constant 0 : index
    %0 = vector.load %arg1[%c0, %c0_0] : memref<16x32xf32, #tpu.memory_space<vmem>>, vector<16x32xf32>
    %c0_1 = arith.constant 0 : index
    %c0_2 = arith.constant 0 : index
    %1 = vector.load %arg2[%c0_1, %c0_2] : memref<32x96xf32, #tpu.memory_space<vmem>>, vector<32x96xf32>
    %c0_3 = arith.constant 0 : index
    %c0_4 = arith.constant 0 : index
    %2 = vector.load %arg4[%c0_3, %c0_4] : memref<32x32xf32, #tpu.memory_space<vmem>>, vector<32x32xf32>
    %c0_5 = arith.constant 0 : index
    %c0_6 = arith.constant 0 : index
    %3 = vector.load %arg5[%c0_5, %c0_6] : memref<1x32xf32, #tpu.memory_space<vmem>>, vector<1x32xf32>
    %cst = arith.constant dense<0.000000e+00> : vector<16x96xf32>
    %4 = tpu.matmul %0, %1, %cst {dimension_numbers = #tpu.dot_dimension_numbers<[1], [0], [0], [1], [0, 0, 1, 1], [], []>} : vector<16x32xf32>, vector<32x96xf32>, vector<16x96xf32> -> vector<16x96xf32>
    %c0_7 = arith.constant 0 : index
    %c0_8 = arith.constant 0 : index
    %5 = vector.load %arg3[%c0_7, %c0_8] : memref<1x96xf32, #tpu.memory_space<vmem>>, vector<1x96xf32>
    %6 = vector.broadcast %5 : vector<1x96xf32> to vector<16x96xf32>
    %7 = arith.addf %4, %6 : vector<16x96xf32>
    %8 = tpu.iota {dimensions = array<i32: 0>} : vector<8x8xi32>
    %9 = tpu.iota {dimensions = array<i32: 1>} : vector<8x8xi32>
    %10 = arith.cmpi sle, %9, %8 : vector<8x8xi32>
    %cst_9 = arith.constant 0.000000e+00 : f32
    %11 = vector.broadcast %cst_9 : f32 to vector<8x32xf32>
    %12 = vector.extract_strided_slice %7 {offsets = [0, 0], sizes = [8, 8], strides = [1, 1]} : vector<16x96xf32> to vector<8x8xf32>
    %cst_10 = arith.constant 0.353553385 : f32
    %13 = vector.broadcast %cst_10 : f32 to vector<8x8xf32>
    %14 = arith.mulf %12, %13 : vector<8x8xf32>
    %15 = vector.extract_strided_slice %7 {offsets = [0, 32], sizes = [8, 8], strides = [1, 1]} : vector<16x96xf32> to vector<8x8xf32>
    %16 = vector.extract_strided_slice %7 {offsets = [0, 64], sizes = [8, 8], strides = [1, 1]} : vector<16x96xf32> to vector<8x8xf32>
    %cst_11 = arith.constant dense<0.000000e+00> : vector<8x8xf32>
    %17 = tpu.matmul %14, %15, %cst_11 {dimension_numbers = #tpu.dot_dimension_numbers<[1], [1], [0], [0], [0, 0, 1, 0], [], []>} : vector<8x8xf32>, vector<8x8xf32>, vector<8x8xf32> -> vector<8x8xf32>
    %cst_12 = arith.constant 0xFF800000 : f32
    %18 = vector.broadcast %cst_12 : f32 to vector<8x8xf32>
    %19 = arith.select %10, %17, %18 : vector<8x8xi1>, vector<8x8xf32>
    %cst_13 = arith.constant dense<0xFF800000> : vector<8xf32>
    %20 = vector.multi_reduction <maximumf>, %19, %cst_13 [1] : vector<8x8xf32> to vector<8xf32>
    %21 = vector.shape_cast %20 : vector<8xf32> to vector<8x1xf32>
    %22 = vector.broadcast %21 : vector<8x1xf32> to vector<8x8xf32>
    %23 = arith.subf %19, %22 : vector<8x8xf32>
    %24 = math.exp %23 : vector<8x8xf32>
    %cst_14 = arith.constant dense<0.000000e+00> : vector<8xf32>
    %25 = vector.multi_reduction <add>, %24, %cst_14 [1] : vector<8x8xf32> to vector<8xf32>
    %26 = vector.shape_cast %25 : vector<8xf32> to vector<8x1xf32>
    %27 = tpu.reciprocal %26 {approx = true} : vector<8x1xf32> -> vector<8x1xf32>
    %28 = vector.broadcast %27 : vector<8x1xf32> to vector<8x8xf32>
    %29 = arith.mulf %24, %28 : vector<8x8xf32>
    %cst_15 = arith.constant dense<0.000000e+00> : vector<8x8xf32>
    %30 = tpu.matmul %29, %16, %cst_15 {dimension_numbers = #tpu.dot_dimension_numbers<[1], [0], [0], [1], [0, 0, 1, 1], [], []>} : vector<8x8xf32>, vector<8x8xf32>, vector<8x8xf32> -> vector<8x8xf32>
    %31 = vector.extract_strided_slice %2 {offsets = [0, 0], sizes = [8, 32], strides = [1, 1]} : vector<32x32xf32> to vector<8x32xf32>
    %cst_16 = arith.constant dense<0.000000e+00> : vector<8x32xf32>
    %32 = tpu.matmul %30, %31, %cst_16 {dimension_numbers = #tpu.dot_dimension_numbers<[1], [0], [0], [1], [0, 0, 1, 1], [], []>} : vector<8x8xf32>, vector<8x32xf32>, vector<8x32xf32> -> vector<8x32xf32>
    %33 = arith.addf %11, %32 : vector<8x32xf32>
    %34 = vector.extract_strided_slice %7 {offsets = [0, 8], sizes = [8, 8], strides = [1, 1]} : vector<16x96xf32> to vector<8x8xf32>
    %cst_17 = arith.constant 0.353553385 : f32
    %35 = vector.broadcast %cst_17 : f32 to vector<8x8xf32>
    %36 = arith.mulf %34, %35 : vector<8x8xf32>
    %37 = vector.extract_strided_slice %7 {offsets = [0, 40], sizes = [8, 8], strides = [1, 1]} : vector<16x96xf32> to vector<8x8xf32>
    %38 = vector.extract_strided_slice %7 {offsets = [0, 72], sizes = [8, 8], strides = [1, 1]} : vector<16x96xf32> to vector<8x8xf32>
    %cst_18 = arith.constant dense<0.000000e+00> : vector<8x8xf32>
    %39 = tpu.matmul %36, %37, %cst_18 {dimension_numbers = #tpu.dot_dimension_numbers<[1], [1], [0], [0], [0, 0, 1, 0], [], []>} : vector<8x8xf32>, vector<8x8xf32>, vector<8x8xf32> -> vector<8x8xf32>
    %cst_19 = arith.constant 0xFF800000 : f32
    %40 = vector.broadcast %cst_19 : f32 to vector<8x8xf32>
    %41 = arith.select %10, %39, %40 : vector<8x8xi1>, vector<8x8xf32>
    %cst_20 = arith.constant dense<0xFF800000> : vector<8xf32>
    %42 = vector.multi_reduction <maximumf>, %41, %cst_20 [1] : vector<8x8xf32> to vector<8xf32>
    %43 = vector.shape_cast %42 : vector<8xf32> to vector<8x1xf32>
    %44 = vector.broadcast %43 : vector<8x1xf32> to vector<8x8xf32>
    %45 = arith.subf %41, %44 : vector<8x8xf32>
    %46 = math.exp %45 : vector<8x8xf32>
    %cst_21 = arith.constant dense<0.000000e+00> : vector<8xf32>
    %47 = vector.multi_reduction <add>, %46, %cst_21 [1] : vector<8x8xf32> to vector<8xf32>
    %48 = vector.shape_cast %47 : vector<8xf32> to vector<8x1xf32>
    %49 = tpu.reciprocal %48 {approx = true} : vector<8x1xf32> -> vector<8x1xf32>
    %50 = vector.broadcast %49 : vector<8x1xf32> to vector<8x8xf32>
    %51 = arith.mulf %46, %50 : vector<8x8xf32>
    %cst_22 = arith.constant dense<0.000000e+00> : vector<8x8xf32>
    %52 = tpu.matmul %51, %38, %cst_22 {dimension_numbers = #tpu.dot_dimension_numbers<[1], [0], [0], [1], [0, 0, 1, 1], [], []>} : vector<8x8xf32>, vector<8x8xf32>, vector<8x8xf32> -> vector<8x8xf32>
    %53 = vector.extract_strided_slice %2 {offsets = [8, 0], sizes = [8, 32], strides = [1, 1]} : vector<32x32xf32> to vector<8x32xf32>
    %cst_23 = arith.constant dense<0.000000e+00> : vector<8x32xf32>
    %54 = tpu.matmul %52, %53, %cst_23 {dimension_numbers = #tpu.dot_dimension_numbers<[1], [0], [0], [1], [0, 0, 1, 1], [], []>} : vector<8x8xf32>, vector<8x32xf32>, vector<8x32xf32> -> vector<8x32xf32>
    %55 = arith.addf %33, %54 : vector<8x32xf32>
    %56 = vector.extract_strided_slice %7 {offsets = [0, 16], sizes = [8, 8], strides = [1, 1]} : vector<16x96xf32> to vector<8x8xf32>
    %cst_24 = arith.constant 0.353553385 : f32
    %57 = vector.broadcast %cst_24 : f32 to vector<8x8xf32>
    %58 = arith.mulf %56, %57 : vector<8x8xf32>
    %59 = vector.extract_strided_slice %7 {offsets = [0, 48], sizes = [8, 8], strides = [1, 1]} : vector<16x96xf32> to vector<8x8xf32>
    %60 = vector.extract_strided_slice %7 {offsets = [0, 80], sizes = [8, 8], strides = [1, 1]} : vector<16x96xf32> to vector<8x8xf32>
    %cst_25 = arith.constant dense<0.000000e+00> : vector<8x8xf32>
    %61 = tpu.matmul %58, %59, %cst_25 {dimension_numbers = #tpu.dot_dimension_numbers<[1], [1], [0], [0], [0, 0, 1, 0], [], []>} : vector<8x8xf32>, vector<8x8xf32>, vector<8x8xf32> -> vector<8x8xf32>
    %cst_26 = arith.constant 0xFF800000 : f32
    %62 = vector.broadcast %cst_26 : f32 to vector<8x8xf32>
    %63 = arith.select %10, %61, %62 : vector<8x8xi1>, vector<8x8xf32>
    %cst_27 = arith.constant dense<0xFF800000> : vector<8xf32>
    %64 = vector.multi_reduction <maximumf>, %63, %cst_27 [1] : vector<8x8xf32> to vector<8xf32>
    %65 = vector.shape_cast %64 : vector<8xf32> to vector<8x1xf32>
    %66 = vector.broadcast %65 : vector<8x1xf32> to vector<8x8xf32>
    %67 = arith.subf %63, %66 : vector<8x8xf32>
    %68 = math.exp %67 : vector<8x8xf32>
    %cst_28 = arith.constant dense<0.000000e+00> : vector<8xf32>
    %69 = vector.multi_reduction <add>, %68, %cst_28 [1] : vector<8x8xf32> to vector<8xf32>
    %70 = vector.shape_cast %69 : vector<8xf32> to vector<8x1xf32>
    %71 = tpu.reciprocal %70 {approx = true} : vector<8x1xf32> -> vector<8x1xf32>
    %72 = vector.broadcast %71 : vector<8x1xf32> to vector<8x8xf32>
    %73 = arith.mulf %68, %72 : vector<8x8xf32>
    %cst_29 = arith.constant dense<0.000000e+00> : vector<8x8xf32>
    %74 = tpu.matmul %73, %60, %cst_29 {dimension_numbers = #tpu.dot_dimension_numbers<[1], [0], [0], [1], [0, 0, 1, 1], [], []>} : vector<8x8xf32>, vector<8x8xf32>, vector<8x8xf32> -> vector<8x8xf32>
    %75 = vector.extract_strided_slice %2 {offsets = [16, 0], sizes = [8, 32], strides = [1, 1]} : vector<32x32xf32> to vector<8x32xf32>
    %cst_30 = arith.constant dense<0.000000e+00> : vector<8x32xf32>
    %76 = tpu.matmul %74, %75, %cst_30 {dimension_numbers = #tpu.dot_dimension_numbers<[1], [0], [0], [1], [0, 0, 1, 1], [], []>} : vector<8x8xf32>, vector<8x32xf32>, vector<8x32xf32> -> vector<8x32xf32>
    %77 = arith.addf %55, %76 : vector<8x32xf32>
    %78 = vector.extract_strided_slice %7 {offsets = [0, 24], sizes = [8, 8], strides = [1, 1]} : vector<16x96xf32> to vector<8x8xf32>
    %cst_31 = arith.constant 0.353553385 : f32
    %79 = vector.broadcast %cst_31 : f32 to vector<8x8xf32>
    %80 = arith.mulf %78, %79 : vector<8x8xf32>
    %81 = vector.extract_strided_slice %7 {offsets = [0, 56], sizes = [8, 8], strides = [1, 1]} : vector<16x96xf32> to vector<8x8xf32>
    %82 = vector.extract_strided_slice %7 {offsets = [0, 88], sizes = [8, 8], strides = [1, 1]} : vector<16x96xf32> to vector<8x8xf32>
    %cst_32 = arith.constant dense<0.000000e+00> : vector<8x8xf32>
    %83 = tpu.matmul %80, %81, %cst_32 {dimension_numbers = #tpu.dot_dimension_numbers<[1], [1], [0], [0], [0, 0, 1, 0], [], []>} : vector<8x8xf32>, vector<8x8xf32>, vector<8x8xf32> -> vector<8x8xf32>
    %cst_33 = arith.constant 0xFF800000 : f32
    %84 = vector.broadcast %cst_33 : f32 to vector<8x8xf32>
    %85 = arith.select %10, %83, %84 : vector<8x8xi1>, vector<8x8xf32>
    %cst_34 = arith.constant dense<0xFF800000> : vector<8xf32>
    %86 = vector.multi_reduction <maximumf>, %85, %cst_34 [1] : vector<8x8xf32> to vector<8xf32>
    %87 = vector.shape_cast %86 : vector<8xf32> to vector<8x1xf32>
    %88 = vector.broadcast %87 : vector<8x1xf32> to vector<8x8xf32>
    %89 = arith.subf %85, %88 : vector<8x8xf32>
    %90 = math.exp %89 : vector<8x8xf32>
    %cst_35 = arith.constant dense<0.000000e+00> : vector<8xf32>
    %91 = vector.multi_reduction <add>, %90, %cst_35 [1] : vector<8x8xf32> to vector<8xf32>
    %92 = vector.shape_cast %91 : vector<8xf32> to vector<8x1xf32>
    %93 = tpu.reciprocal %92 {approx = true} : vector<8x1xf32> -> vector<8x1xf32>
    %94 = vector.broadcast %93 : vector<8x1xf32> to vector<8x8xf32>
    %95 = arith.mulf %90, %94 : vector<8x8xf32>
    %cst_36 = arith.constant dense<0.000000e+00> : vector<8x8xf32>
    %96 = tpu.matmul %95, %82, %cst_36 {dimension_numbers = #tpu.dot_dimension_numbers<[1], [0], [0], [1], [0, 0, 1, 1], [], []>} : vector<8x8xf32>, vector<8x8xf32>, vector<8x8xf32> -> vector<8x8xf32>
    %97 = vector.extract_strided_slice %2 {offsets = [24, 0], sizes = [8, 32], strides = [1, 1]} : vector<32x32xf32> to vector<8x32xf32>
    %cst_37 = arith.constant dense<0.000000e+00> : vector<8x32xf32>
    %98 = tpu.matmul %96, %97, %cst_37 {dimension_numbers = #tpu.dot_dimension_numbers<[1], [0], [0], [1], [0, 0, 1, 1], [], []>} : vector<8x8xf32>, vector<8x32xf32>, vector<8x32xf32> -> vector<8x32xf32>
    %99 = arith.addf %77, %98 : vector<8x32xf32>
    %100 = vector.broadcast %3 : vector<1x32xf32> to vector<8x32xf32>
    %101 = arith.addf %99, %100 : vector<8x32xf32>
    %c0_38 = arith.constant 0 : index
    %c0_39 = arith.constant 0 : index
    %102 = vector.load %arg6[%c0_38, %c0_39] : memref<16x32xf32, #tpu.memory_space<vmem>>, vector<8x32xf32>
    tpu.vector_store %arg6[%c0_38, %c0_39], %101 {strides = array<i32>} : memref<16x32xf32, #tpu.memory_space<vmem>>, vector<8x32xf32>,
    %cst_40 = arith.constant 0.000000e+00 : f32
    %103 = vector.broadcast %cst_40 : f32 to vector<8x32xf32>
    %104 = vector.extract_strided_slice %7 {offsets = [8, 0], sizes = [8, 8], strides = [1, 1]} : vector<16x96xf32> to vector<8x8xf32>
    %cst_41 = arith.constant 0.353553385 : f32
    %105 = vector.broadcast %cst_41 : f32 to vector<8x8xf32>
    %106 = arith.mulf %104, %105 : vector<8x8xf32>
    %107 = vector.extract_strided_slice %7 {offsets = [8, 32], sizes = [8, 8], strides = [1, 1]} : vector<16x96xf32> to vector<8x8xf32>
    %108 = vector.extract_strided_slice %7 {offsets = [8, 64], sizes = [8, 8], strides = [1, 1]} : vector<16x96xf32> to vector<8x8xf32>
    %cst_42 = arith.constant dense<0.000000e+00> : vector<8x8xf32>
    %109 = tpu.matmul %106, %107, %cst_42 {dimension_numbers = #tpu.dot_dimension_numbers<[1], [1], [0], [0], [0, 0, 1, 0], [], []>} : vector<8x8xf32>, vector<8x8xf32>, vector<8x8xf32> -> vector<8x8xf32>
    %cst_43 = arith.constant 0xFF800000 : f32
    %110 = vector.broadcast %cst_43 : f32 to vector<8x8xf32>
    %111 = arith.select %10, %109, %110 : vector<8x8xi1>, vector<8x8xf32>
    %cst_44 = arith.constant dense<0xFF800000> : vector<8xf32>
    %112 = vector.multi_reduction <maximumf>, %111, %cst_44 [1] : vector<8x8xf32> to vector<8xf32>
    %113 = vector.shape_cast %112 : vector<8xf32> to vector<8x1xf32>
    %114 = vector.broadcast %113 : vector<8x1xf32> to vector<8x8xf32>
    %115 = arith.subf %111, %114 : vector<8x8xf32>
    %116 = math.exp %115 : vector<8x8xf32>
    %cst_45 = arith.constant dense<0.000000e+00> : vector<8xf32>
    %117 = vector.multi_reduction <add>, %116, %cst_45 [1] : vector<8x8xf32> to vector<8xf32>
    %118 = vector.shape_cast %117 : vector<8xf32> to vector<8x1xf32>
    %119 = tpu.reciprocal %118 {approx = true} : vector<8x1xf32> -> vector<8x1xf32>
    %120 = vector.broadcast %119 : vector<8x1xf32> to vector<8x8xf32>
    %121 = arith.mulf %116, %120 : vector<8x8xf32>
    %cst_46 = arith.constant dense<0.000000e+00> : vector<8x8xf32>
    %122 = tpu.matmul %121, %108, %cst_46 {dimension_numbers = #tpu.dot_dimension_numbers<[1], [0], [0], [1], [0, 0, 1, 1], [], []>} : vector<8x8xf32>, vector<8x8xf32>, vector<8x8xf32> -> vector<8x8xf32>
    %123 = vector.extract_strided_slice %2 {offsets = [0, 0], sizes = [8, 32], strides = [1, 1]} : vector<32x32xf32> to vector<8x32xf32>
    %cst_47 = arith.constant dense<0.000000e+00> : vector<8x32xf32>
    %124 = tpu.matmul %122, %123, %cst_47 {dimension_numbers = #tpu.dot_dimension_numbers<[1], [0], [0], [1], [0, 0, 1, 1], [], []>} : vector<8x8xf32>, vector<8x32xf32>, vector<8x32xf32> -> vector<8x32xf32>
    %125 = arith.addf %103, %124 : vector<8x32xf32>
    %126 = vector.extract_strided_slice %7 {offsets = [8, 8], sizes = [8, 8], strides = [1, 1]} : vector<16x96xf32> to vector<8x8xf32>
    %cst_48 = arith.constant 0.353553385 : f32
    %127 = vector.broadcast %cst_48 : f32 to vector<8x8xf32>
    %128 = arith.mulf %126, %127 : vector<8x8xf32>
    %129 = vector.extract_strided_slice %7 {offsets = [8, 40], sizes = [8, 8], strides = [1, 1]} : vector<16x96xf32> to vector<8x8xf32>
    %130 = vector.extract_strided_slice %7 {offsets = [8, 72], sizes = [8, 8], strides = [1, 1]} : vector<16x96xf32> to vector<8x8xf32>
    %cst_49 = arith.constant dense<0.000000e+00> : vector<8x8xf32>
    %131 = tpu.matmul %128, %129, %cst_49 {dimension_numbers = #tpu.dot_dimension_numbers<[1], [1], [0], [0], [0, 0, 1, 0], [], []>} : vector<8x8xf32>, vector<8x8xf32>, vector<8x8xf32> -> vector<8x8xf32>
    %cst_50 = arith.constant 0xFF800000 : f32
    %132 = vector.broadcast %cst_50 : f32 to vector<8x8xf32>
    %133 = arith.select %10, %131, %132 : vector<8x8xi1>, vector<8x8xf32>
    %cst_51 = arith.constant dense<0xFF800000> : vector<8xf32>
    %134 = vector.multi_reduction <maximumf>, %133, %cst_51 [1] : vector<8x8xf32> to vector<8xf32>
    %135 = vector.shape_cast %134 : vector<8xf32> to vector<8x1xf32>
    %136 = vector.broadcast %135 : vector<8x1xf32> to vector<8x8xf32>
    %137 = arith.subf %133, %136 : vector<8x8xf32>
    %138 = math.exp %137 : vector<8x8xf32>
    %cst_52 = arith.constant dense<0.000000e+00> : vector<8xf32>
    %139 = vector.multi_reduction <add>, %138, %cst_52 [1] : vector<8x8xf32> to vector<8xf32>
    %140 = vector.shape_cast %139 : vector<8xf32> to vector<8x1xf32>
    %141 = tpu.reciprocal %140 {approx = true} : vector<8x1xf32> -> vector<8x1xf32>
    %142 = vector.broadcast %141 : vector<8x1xf32> to vector<8x8xf32>
    %143 = arith.mulf %138, %142 : vector<8x8xf32>
    %cst_53 = arith.constant dense<0.000000e+00> : vector<8x8xf32>
    %144 = tpu.matmul %143, %130, %cst_53 {dimension_numbers = #tpu.dot_dimension_numbers<[1], [0], [0], [1], [0, 0, 1, 1], [], []>} : vector<8x8xf32>, vector<8x8xf32>, vector<8x8xf32> -> vector<8x8xf32>
    %145 = vector.extract_strided_slice %2 {offsets = [8, 0], sizes = [8, 32], strides = [1, 1]} : vector<32x32xf32> to vector<8x32xf32>
    %cst_54 = arith.constant dense<0.000000e+00> : vector<8x32xf32>
    %146 = tpu.matmul %144, %145, %cst_54 {dimension_numbers = #tpu.dot_dimension_numbers<[1], [0], [0], [1], [0, 0, 1, 1], [], []>} : vector<8x8xf32>, vector<8x32xf32>, vector<8x32xf32> -> vector<8x32xf32>
    %147 = arith.addf %125, %146 : vector<8x32xf32>
    %148 = vector.extract_strided_slice %7 {offsets = [8, 16], sizes = [8, 8], strides = [1, 1]} : vector<16x96xf32> to vector<8x8xf32>
    %cst_55 = arith.constant 0.353553385 : f32
    %149 = vector.broadcast %cst_55 : f32 to vector<8x8xf32>
    %150 = arith.mulf %148, %149 : vector<8x8xf32>
    %151 = vector.extract_strided_slice %7 {offsets = [8, 48], sizes = [8, 8], strides = [1, 1]} : vector<16x96xf32> to vector<8x8xf32>
    %152 = vector.extract_strided_slice %7 {offsets = [8, 80], sizes = [8, 8], strides = [1, 1]} : vector<16x96xf32> to vector<8x8xf32>
    %cst_56 = arith.constant dense<0.000000e+00> : vector<8x8xf32>
    %153 = tpu.matmul %150, %151, %cst_56 {dimension_numbers = #tpu.dot_dimension_numbers<[1], [1], [0], [0], [0, 0, 1, 0], [], []>} : vector<8x8xf32>, vector<8x8xf32>, vector<8x8xf32> -> vector<8x8xf32>
    %cst_57 = arith.constant 0xFF800000 : f32
    %154 = vector.broadcast %cst_57 : f32 to vector<8x8xf32>
    %155 = arith.select %10, %153, %154 : vector<8x8xi1>, vector<8x8xf32>
    %cst_58 = arith.constant dense<0xFF800000> : vector<8xf32>
    %156 = vector.multi_reduction <maximumf>, %155, %cst_58 [1] : vector<8x8xf32> to vector<8xf32>
    %157 = vector.shape_cast %156 : vector<8xf32> to vector<8x1xf32>
    %158 = vector.broadcast %157 : vector<8x1xf32> to vector<8x8xf32>
    %159 = arith.subf %155, %158 : vector<8x8xf32>
    %160 = math.exp %159 : vector<8x8xf32>
    %cst_59 = arith.constant dense<0.000000e+00> : vector<8xf32>
    %161 = vector.multi_reduction <add>, %160, %cst_59 [1] : vector<8x8xf32> to vector<8xf32>
    %162 = vector.shape_cast %161 : vector<8xf32> to vector<8x1xf32>
    %163 = tpu.reciprocal %162 {approx = true} : vector<8x1xf32> -> vector<8x1xf32>
    %164 = vector.broadcast %163 : vector<8x1xf32> to vector<8x8xf32>
    %165 = arith.mulf %160, %164 : vector<8x8xf32>
    %cst_60 = arith.constant dense<0.000000e+00> : vector<8x8xf32>
    %166 = tpu.matmul %165, %152, %cst_60 {dimension_numbers = #tpu.dot_dimension_numbers<[1], [0], [0], [1], [0, 0, 1, 1], [], []>} : vector<8x8xf32>, vector<8x8xf32>, vector<8x8xf32> -> vector<8x8xf32>
    %167 = vector.extract_strided_slice %2 {offsets = [16, 0], sizes = [8, 32], strides = [1, 1]} : vector<32x32xf32> to vector<8x32xf32>
    %cst_61 = arith.constant dense<0.000000e+00> : vector<8x32xf32>
    %168 = tpu.matmul %166, %167, %cst_61 {dimension_numbers = #tpu.dot_dimension_numbers<[1], [0], [0], [1], [0, 0, 1, 1], [], []>} : vector<8x8xf32>, vector<8x32xf32>, vector<8x32xf32> -> vector<8x32xf32>
    %169 = arith.addf %147, %168 : vector<8x32xf32>
    %170 = vector.extract_strided_slice %7 {offsets = [8, 24], sizes = [8, 8], strides = [1, 1]} : vector<16x96xf32> to vector<8x8xf32>
    %cst_62 = arith.constant 0.353553385 : f32
    %171 = vector.broadcast %cst_62 : f32 to vector<8x8xf32>
    %172 = arith.mulf %170, %171 : vector<8x8xf32>
    %173 = vector.extract_strided_slice %7 {offsets = [8, 56], sizes = [8, 8], strides = [1, 1]} : vector<16x96xf32> to vector<8x8xf32>
    %174 = vector.extract_strided_slice %7 {offsets = [8, 88], sizes = [8, 8], strides = [1, 1]} : vector<16x96xf32> to vector<8x8xf32>
    %cst_63 = arith.constant dense<0.000000e+00> : vector<8x8xf32>
    %175 = tpu.matmul %172, %173, %cst_63 {dimension_numbers = #tpu.dot_dimension_numbers<[1], [1], [0], [0], [0, 0, 1, 0], [], []>} : vector<8x8xf32>, vector<8x8xf32>, vector<8x8xf32> -> vector<8x8xf32>
    %cst_64 = arith.constant 0xFF800000 : f32
    %176 = vector.broadcast %cst_64 : f32 to vector<8x8xf32>
    %177 = arith.select %10, %175, %176 : vector<8x8xi1>, vector<8x8xf32>
    %cst_65 = arith.constant dense<0xFF800000> : vector<8xf32>
    %178 = vector.multi_reduction <maximumf>, %177, %cst_65 [1] : vector<8x8xf32> to vector<8xf32>
    %179 = vector.shape_cast %178 : vector<8xf32> to vector<8x1xf32>
    %180 = vector.broadcast %179 : vector<8x1xf32> to vector<8x8xf32>
    %181 = arith.subf %177, %180 : vector<8x8xf32>
    %182 = math.exp %181 : vector<8x8xf32>
    %cst_66 = arith.constant dense<0.000000e+00> : vector<8xf32>
    %183 = vector.multi_reduction <add>, %182, %cst_66 [1] : vector<8x8xf32> to vector<8xf32>
    %184 = vector.shape_cast %183 : vector<8xf32> to vector<8x1xf32>
    %185 = tpu.reciprocal %184 {approx = true} : vector<8x1xf32> -> vector<8x1xf32>
    %186 = vector.broadcast %185 : vector<8x1xf32> to vector<8x8xf32>
    %187 = arith.mulf %182, %186 : vector<8x8xf32>
    %cst_67 = arith.constant dense<0.000000e+00> : vector<8x8xf32>
    %188 = tpu.matmul %187, %174, %cst_67 {dimension_numbers = #tpu.dot_dimension_numbers<[1], [0], [0], [1], [0, 0, 1, 1], [], []>} : vector<8x8xf32>, vector<8x8xf32>, vector<8x8xf32> -> vector<8x8xf32>
    %189 = vector.extract_strided_slice %2 {offsets = [24, 0], sizes = [8, 32], strides = [1, 1]} : vector<32x32xf32> to vector<8x32xf32>
    %cst_68 = arith.constant dense<0.000000e+00> : vector<8x32xf32>
    %190 = tpu.matmul %188, %189, %cst_68 {dimension_numbers = #tpu.dot_dimension_numbers<[1], [0], [0], [1], [0, 0, 1, 1], [], []>} : vector<8x8xf32>, vector<8x32xf32>, vector<8x32xf32> -> vector<8x32xf32>
    %191 = arith.addf %169, %190 : vector<8x32xf32>
    %192 = vector.broadcast %3 : vector<1x32xf32> to vector<8x32xf32>
    %193 = arith.addf %191, %192 : vector<8x32xf32>
    %c8 = arith.constant 8 : index
    %c0_69 = arith.constant 0 : index
    %194 = vector.load %arg6[%c8, %c0_69] : memref<16x32xf32, #tpu.memory_space<vmem>>, vector<8x32xf32>
    tpu.vector_store %arg6[%c8, %c0_69], %193 {strides = array<i32>} : memref<16x32xf32, #tpu.memory_space<vmem>>, vector<8x32xf32>,
    return
  }
  func.func @transform_0(%arg0: i32) -> (i32, i32) {
    %c0_i32 = arith.constant 0 : i32
    %c0_i32_0 = arith.constant 0 : i32
    %c0_i32_1 = arith.constant 0 : i32
    return %c0_i32, %c0_i32_0 : i32, i32
  }
  func.func @transform_1(%arg0: i32) -> (i32, i32) {
    %c0_i32 = arith.constant 0 : i32
    %c0_i32_0 = arith.constant 0 : i32
    %c0_i32_1 = arith.constant 0 : i32
    return %c0_i32, %c0_i32_0 : i32, i32
  }
  func.func @transform_2(%arg0: i32) -> (i32, i32) {
    %c0_i32 = arith.constant 0 : i32
    %c0_i32_0 = arith.constant 0 : i32
    %c0_i32_1 = arith.constant 0 : i32
    return %c0_i32, %c0_i32_0 : i32, i32
  }
  func.func @transform_3(%arg0: i32) -> (i32, i32) {
    %c0_i32 = arith.constant 0 : i32
    %c0_i32_0 = arith.constant 0 : i32
    %c0_i32_1 = arith.constant 0 : i32
    return %c0_i32, %c0_i32_0 : i32, i32
  }
  func.func @transform_4(%arg0: i32) -> (i32, i32) {
    %c0_i32 = arith.constant 0 : i32
    %c0_i32_0 = arith.constant 0 : i32
    %c0_i32_1 = arith.constant 0 : i32
    return %c0_i32, %c0_i32_0 : i32, i32
  }
  func.func @transform_5(%arg0: i32) -> (i32, i32) {
    %c0_i32 = arith.constant 0 : i32
    %c0_i32_0 = arith.constant 0 : i32
    %c0_i32_1 = arith.constant 0 : i32
    return %c0_i32, %c0_i32_0 : i32, i32
  }
}

</mosaic_0001>

<bundles_post_ra>
// kernel: tpu_custom_call.1
= control target key start
LH: loop header
LB: loop body
LE: loop exit
PB: predicated region body
PF: predicated region fallthrough
CT: control target
= control target key end

     0   :  { %10 = vsyncpa [#allocation3], 0  ;;  %s2774_s0 = inlined_call_operand.hbm [shape: f32[16,32], index: 0, kind: input, shape index: {}]   ;;  %s2775_s1 = inlined_call_operand.hbm [shape: f32[32,96], index: 1, kind: input, shape index: {}]   ;;  %s2776_s2 = inlined_call_operand.vmem [shape: f32[1,96], index: 2, kind: input, shape index: {}]   ;;  %s2777_s3 = inlined_call_operand.hbm [shape: f32[32,32], index: 3, kind: input, shape index: {}]   ;;  %s2778_s4 = inlined_call_operand.vmem [shape: f32[1,32], index: 4, kind: input, shape index: {}]   ;;  %s2779_s5 = inlined_call_operand.hbm [shape: f32[16,32], index: 5, kind: output, shape index: {}]  }
   0x1   :  { %11 = vsyncpa [#allocation6], 0 }
   0x2   :  { %12 = vsyncpa [#allocation4], 0  ;;  %s2472_s18 = smov [#allocation5]   ;;  %s2473_s20 = smov [#allocation2]  }
   0x3   :  { %s30_s19 = sshll.u32 %s2472_s18, 4  ;;  %s18_s21 = sshll.u32 %s2473_s20, 4  ;;  %s31_s19 = int_to_ptr.vmem [resolvable:$true] %s30_s19  ;;  %s19_s21 = int_to_ptr.vmem [resolvable:$true] %s18_s21 }
   0x4   :  { %s2394_s22 = scalar_lea.vmem %s31_s19, 512  ;;  %p2399_p1 = scmp.lt.s32.totalorder %s31_s19, %s31_s19 }
   0x5   :  { %p2395_p0 = scmp.ne.s32.totalorder %s31_s19, %s2394_s22  ;;  %p2400_p2 = scmp.lt.s32.totalorder %s2394_s22, %s2394_s22 }
   0x7   :  { %p2401_p3 = por %p2400_p2, %p2399_p1 }
   0x9   :  { %p2402_p4 = pnand %p2401_p3, %p2395_p0 }
   0xb   :  { %2405 = shalt.err (!%p2402_p4)
}
   0xc   :  { %s2474_s23 = smov 128   ;;  %s2475_s24 = smov 8  }
   0xd   :  { %36 = dma.hbm_to_vmem [thread:$0]  %s2775_s1, 512, %s31_s19, [#allocation6], %s2474_s23, %s2474_s23, %s2475_s24  }
   0xe   :  { %s2414_s27 = scalar_lea.vmem %s19_s21, 256  ;;  %p2419_p6 = scmp.lt.s32.totalorder %s19_s21, %s19_s21 }
   0xf   :  { %p2415_p5 = scmp.ne.s32.totalorder %s19_s21, %s2414_s27  ;;  %p2420_p7 = scmp.lt.s32.totalorder %s2414_s27, %s2414_s27 }
  0x11   :  { %p2421_p8 = por %p2420_p7, %p2419_p6 }
  0x13   :  { %p2422_p9 = pnand %p2421_p8, %p2415_p5 }
  0x15   :  { %2425 = shalt.err (!%p2422_p9)
}
  0x16   :  { %24 = dma.hbm_to_vmem [thread:$0]  %s2774_s0, 256, %s19_s21, [#allocation3], %s2474_s23, %s2474_s23, %s2475_s24  }
  0x17   :  { %s2476_s30 = smov [#allocation7]  }
  0x18   :  { %s44_s6 = sshll.u32 %s2476_s30, 4  ;;  %s45_s6 = int_to_ptr.vmem [resolvable:$true] %s44_s6 }
  0x19   :  { %s2434_s7 = scalar_lea.vmem %s45_s6, 512  ;;  %p2439_p11 = scmp.lt.s32.totalorder %s45_s6, %s45_s6 }
  0x1a   :  { %p2435_p10 = scmp.ne.s32.totalorder %s45_s6, %s2434_s7  ;;  %p2440_p12 = scmp.lt.s32.totalorder %s2434_s7, %s2434_s7 }
  0x1c   :  { %p2441_p13 = por %p2440_p12, %p2439_p11 }
  0x1e   :  { %p2442_p0 = pnand %p2441_p13, %p2435_p10 }
  0x20   :  { %2445 = shalt.err (!%p2442_p0)
}
  0x21   :  { %50 = dma.hbm_to_vmem [thread:$0]  %s2777_s3, 512, %s45_s6, [#allocation6], %s2474_s23, %s2474_s23, %s2475_s24  }
  0x22   :  { %2466 = dma.done.wait [#allocation3], 256  }
  0x23   :  { %2467 = vsyncadd [#allocation3], 4294967040 }
  0x24   :  { %2468 = dma.done.wait [#allocation6], 1024  }
  0x25   :  { %2469 = vsyncadd [#allocation6], 4294966272  ;;  %vm80_vm0 = vcmask 261120   ;;  %v67_v0 = vld [vmem:[#allocation5 + $0x18] sm:$0xff]  ;;  %v66_v1 = vld [vmem:[#allocation5 + $0x10] sm:$0xff]  ;;  %v2477_v6 = vmov 0.0   ;;  %v162_v16 = vlaneseq }
  0x26   :  { %2204 = vmatprep.subr.mxu0 %v67_v0  ;;  %v62_v2 = vld [vmem:[#allocation2] sm:$0xff]  ;;  %v65_v3 = vld [vmem:[#allocation5 + $0x8] sm:$0xff]  ;;  %v64_v4 = vld [vmem:[#allocation5] sm:$0xff]  ;;  %2215 = vmatprep.subr.mxu1 %v2477_v6  ;;  %vm2478_vm1 = vmmov 0   ;;  %s2479_s9 = smov 96   ;;  %s2480_s10 = smov 120  }
  0x27   :  { %2205 = vmatpush3.msra.mxu0 %v67_v0  ;;  %2212 = vmatprep.mubr.msk.f32.mxu0 %vm80_vm0, %v62_v2  ;;  %v63_v5 = vld [vmem:[#allocation2 + $0x8] sm:$0xff]  ;;  %v2114_v7 = vld [vmem:[%s2776_s2] ss:$0 sm:$0xff]  ;;  %s2481_s11 = smov 88   ;;  %vm171_vm2 = vcmask 64512   ;;  %v163_v17 = vshrl.u32 %v162_v16, 7 }
  0x28   :  { %2206 = vmatprep.subr.mxu0 %v66_v1  ;;  %2217 = vmatprep.mubr.msk.f32.mxu1 %vm2478_vm1, %v2477_v6  ;;  %v165_v18 = vand.u32 127, %v162_v16  ;;  %s2482_s2 = smov 56   ;;  %s2483_s12 = smov 64   ;;  %v2602_v46 = vld [vmem:[#allocation7] sm:$0xff]  ;;  %v2605_v47 = vld [vmem:[#allocation7 + $0x8] sm:$0xff] }
  0x29   :  { %2207 = vmatpush3.msra.mxu0 %v66_v1  ;;  %s2484_s13 = smov 80   ;;  %s2485_s14 = smov 112  }
  0x2a   :  { %2208 = vmatprep.subr.mxu0 %v65_v3  ;;  %vm2574_vm3 = vcmp.le.s32.totalorder %v165_v18, %v163_v17  ;;  %s2486_s15 = smov 72   ;;  %s2487_s16 = smov 104  }
  0x2b   :  { %2209 = vmatpush3.msra.mxu0 %v65_v3  ;;  %s2488_s17 = smov 48   ;;  %s2489_s18 = smov 40  }
  0x2c   :  { %2210 = vmatprep.subr.mxu0 %v64_v4 }
  0x2d   :  { %2211 = vmatpush3.msra.mxu0 %v64_v4 }
  0x2e   :  { %2213 = vmatmul.mubr.msk.f32.vlgmr.msra.gmra.mxu0 %vm80_vm0, %v63_v5  ;;  %2225 = vmatprep.subr.mxu0 %v2477_v6 }
  0x2f   :  { %2227 = vmatprep.mubr.msk.f32.mxu0 %vm2478_vm1, %v2477_v6 }
  0xee   :  { %v2214_v8 = vpop.f32.mrf.mxu0 }
  0xef   :  { %v2550_v9 = vadd.f32 %v2214_v8, %v2114_v7 }
  0xf0   :  { %v153_v10 = vpop.f32.mrf.mxu0 }
  0xf1   :  { %v2552_v11 = vadd.f32 %v2114_v7, %v153_v10 }
  0xf3   :  { %169 = vrot.lane.b32.xlu0 %v2552_v11, %s2479_s9  ;;  %v2557_v12 = vmul.f32 0.35355338, %v2552_v11 }
  0xf5   :  { %335 = vrot.lane.b32.xlu1 %v2557_v12, %s2480_s10 }
  0xf7   :  { %337 = vrot.lane.b32.xlu0 %v2552_v11, %s2481_s11 }
 0x165   :  { %v170_v13 = vpop.permute.xlu0 %169 }
 0x166   :  { %2216 = vmatpush3.xpose.msk.msra.mxu1 %vm171_vm2, %v170_v13  ;;  %v2644_v13 = vld [vmem:[#allocation7 + $0x10] sm:$0xff] }
 0x167   :  { %2220 = vmatprep.subr.mxu1 %v2477_v6  ;;  %v336_v15 = vpop.permute.xlu1 %335 }
 0x169   :  { %v338_v14 = vpop.permute.xlu0 %337  ;;  %2218 = vmatmul.mubr.msk.f32.vlgmr.msra.gmra.mxu1 %vm171_vm2, %v2557_v12 }
 0x16a   :  { %2226 = vmatpush3.xpose.msk.msra.mxu0 %vm171_vm2, %v338_v14  ;;  %2222 = vmatprep.mubr.msk.f32.mxu1 %vm2478_vm1, %v2477_v6 }
 0x16b   :  { %2235 = vmatprep.subr.mxu0 %v2477_v6 }
 0x16d   :  { %2228 = vmatmul.mubr.msk.f32.vlgmr.msra.gmra.mxu0 %vm171_vm2, %v336_v15 }
 0x16e   :  { %2237 = vmatprep.mubr.msk.f32.mxu0 %vm2478_vm1, %v2477_v6  ;;  %2236 = vmatpush3.msra.mxu0 %v2605_v47 }
 0x16f   :  { %2245 = vmatprep.subr.mxu0 %v2477_v6 }
 0x229   :  { %v243_v20 = vpop.f32.mrf.mxu1 }
 0x22a   :  { %v247_v21 = vsel %vm2574_vm3, %v243_v20, -inf }
 0x22b   :  { %v2219_v22 = vpop.f32.mrf.mxu1  ;;  %v248_v23 = vsel %vm171_vm2, %v247_v21, -inf }
 0x22c   :  { %249 = vmax.xlane.f32.xlu1 %v248_v23 }
 0x22d   :  { %v409_v24 = vpop.f32.mrf.mxu0 }
 0x22e   :  { %v413_v25 = vsel %vm2574_vm3, %v409_v24, -inf }
 0x22f   :  { %v2229_v26 = vpop.f32.mrf.mxu0  ;;  %v414_v27 = vsel %vm171_vm2, %v413_v25, -inf }
 0x230   :  { %415 = vmax.xlane.f32.xlu0 %v414_v27  ;;  %v2661_v27 = vmul.f32 0.35355338, %v2550_v9 }
 0x2b5   :  { %v250_v28 = vpop.xlane.xlu1 %249 }
 0x2b6   :  { %v251_v29 = vsub.f32 %v247_v21, %v250_v28 }
 0x2b8   :  { %v252_v30 = vmul.f32 1.442695, %v251_v29 }
 0x2b9   :  { %v416_v31 = vpop.xlane.xlu0 %415 }
 0x2ba   :  { %2354 = vpow2.f32 %v252_v30  ;;  %v417_v32 = vsub.f32 %v413_v25, %v416_v31 }
 0x2bc   :  { %v418_v33 = vmul.f32 1.442695, %v417_v32 }
 0x2be   :  { %2356 = vpow2.f32 %v418_v33 }
 0x2c7   :  { %v2355_v34 = vpop.eup %2354 }
 0x2c8   :  { %v254_v35 = vsel %vm171_vm2, %v2355_v34, 0.0 }
 0x2c9   :  { %255 = vadd.xlane.f32.xlu0 %v254_v35 }
 0x2cb   :  { %v2357_v36 = vpop.eup %2356 }
 0x2cc   :  { %v420_v37 = vsel %vm171_vm2, %v2357_v36, 0.0 }
 0x2cd   :  { %421 = vadd.xlane.f32.xlu1 %v420_v37 }
 0x2de   :  { %425 = vrot.lane.b32.xlu1 %v2552_v11, %s2482_s2 }
 0x2df   :  { %259 = vrot.lane.b32.xlu0 %v2552_v11, %s2483_s12 }
 0x2e2   :  { %649 = vrot.lane.b32.xlu1 %v2552_v11, %s2484_s13 }
 0x2e3   :  { %647 = vrot.lane.b32.xlu0 %v2557_v12, %s2485_s14 }
 0x352   :  { %v256_v38 = vpop.xlane.xlu0 %255 }
 0x353   :  { %2358 = vrcp.f32 %v256_v38 }
 0x356   :  { %v260_v39 = vpop.permute.xlu0 %259  ;;  %v422_v40 = vpop.xlane.xlu1 %421 }
 0x357   :  { %2360 = vrcp.f32 %v422_v40  ;;  %2221 = vmatpush3.msra.mxu1 %v260_v39 }
 0x358   :  { %2230 = vmatprep.subr.mxu1 %v2477_v6 }
 0x35a   :  { %v426_v43 = vpop.permute.xlu1 %425  ;;  %v648_v53 = vpop.permute.xlu0 %647 }
 0x35e   :  { %v650_v51 = vpop.permute.xlu1 %649 }
 0x360   :  { %v2359_v41 = vpop.eup %2358 }
 0x361   :  { %v258_v42 = vmul.f32 %v2359_v41, %v2355_v34 }
 0x363   :  { %2223 = vmatmul.mubr.msk.f32.vlgmr.msra.gmra.mxu1 %vm171_vm2, %v258_v42 }
 0x364   :  { %v2361_v44 = vpop.eup %2360  ;;  %2231 = vmatpush3.msra.mxu1 %v426_v43  ;;  %2232 = vmatprep.mubr.msk.f32.mxu1 %vm2478_vm1, %v2477_v6 }
 0x365   :  { %v424_v45 = vmul.f32 %v2361_v44, %v2357_v36  ;;  %2240 = vmatprep.subr.mxu1 %v2477_v6  ;;  %v2682_v36 = vld [vmem:[#allocation7 + $0x18] sm:$0xff] }
 0x367   :  { %2233 = vmatmul.mubr.msk.f32.vlgmr.msra.gmra.mxu1 %vm171_vm2, %v424_v45 }
 0x368   :  { %2242 = vmatprep.mubr.msk.f32.mxu1 %vm2478_vm1, %v2477_v6  ;;  %2241 = vmatpush3.msra.mxu1 %v2602_v46 }
 0x369   :  { %2250 = vmatprep.subr.mxu1 %v2477_v6 }
 0x423   :  { %v331_v48 = vpop.f32.mrf.mxu1 }
 0x424   :  { %2243 = vmatmul.mubr.msk.f32.vlgmr.msra.gmra.mxu1 %vm171_vm2, %v331_v48 }
 0x425   :  { %v2224_v49 = vpop.f32.mrf.mxu1  ;;  %2252 = vmatprep.mubr.msk.f32.mxu1 %vm2478_vm1, %v2477_v6 }
 0x427   :  { %v497_v50 = vpop.f32.mrf.mxu1 }
 0x428   :  { %2238 = vmatmul.mubr.msk.f32.vlgmr.msra.gmra.mxu0 %vm171_vm2, %v497_v50 }
 0x429   :  { %2246 = vmatpush3.xpose.msk.msra.mxu0 %vm171_vm2, %v650_v51  ;;  %v2234_v52 = vpop.f32.mrf.mxu1  ;;  %2247 = vmatprep.mubr.msk.f32.mxu0 %vm2478_vm1, %v2477_v6 }
 0x42a   :  { %2255 = vmatprep.subr.mxu0 %v2477_v6 }
 0x42c   :  { %2248 = vmatmul.mubr.msk.f32.vlgmr.msra.gmra.mxu0 %vm171_vm2, %v648_v53 }
 0x42d   :  { %2257 = vmatprep.mubr.msk.f32.mxu0 %vm2478_vm1, %v2477_v6  ;;  %2256 = vmatpush3.msra.mxu0 %v2644_v13 }
 0x42e   :  { %2265 = vmatprep.subr.mxu0 %v2477_v6 }
 0x4e4   :  { %v643_v54 = vpop.f32.mrf.mxu1 }
 0x4e6   :  { %v2244_v55 = vpop.f32.mrf.mxu1 }
 0x4e8   :  { %v570_v56 = vpop.f32.mrf.mxu0 }
 0x4e9   :  { %v2621_v57 = vadd.f32 %v643_v54, %v570_v56 }
 0x4ea   :  { %v2239_v58 = vpop.f32.mrf.mxu0 }
 0x4ec   :  { %v721_v59 = vpop.f32.mrf.mxu0 }
 0x4ed   :  { %v725_v60 = vsel %vm2574_vm3, %v721_v59, -inf  ;;  %v2709_v59 = vld [vmem:[%s2778_s4] ss:$0 sm:$0xff]  ;;  %s2490_s4 = smov [#allocation8]  }
 0x4ee   :  { %v2249_v61 = vpop.f32.mrf.mxu0  ;;  %v726_v62 = vsel %vm171_vm2, %v725_v60, -inf  ;;  %s2101_s21 = sshll.u32 %s2490_s4, 4  ;;  %s2102_s21 = int_to_ptr.vmem [resolvable:$true] %s2101_s21 }
 0x4ef   :  { %727 = vmax.xlane.f32.xlu1 %v726_v62  ;;  %s2446_s22 = scalar_lea.vmem %s2102_s21, 256  ;;  %p2451_p2 = scmp.lt.s32.totalorder %s2102_s21, %s2102_s21 }
 0x4f0   :  { %p2447_p1 = scmp.ne.s32.totalorder %s2102_s21, %s2446_s22  ;;  %p2452_p3 = scmp.lt.s32.totalorder %s2446_s22, %s2446_s22 }
 0x4f2   :  { %p2453_p4 = por %p2452_p3, %p2451_p2 }
 0x4f4   :  { %p2454_p5 = pnand %p2453_p4, %p2447_p1 }
 0x500   :  { %889 = vrot.lane.b32.xlu1 %v2552_v11, %s2486_s15 }
 0x504   :  { %887 = vrot.lane.b32.xlu1 %v2557_v12, %s2487_s16 }
 0x508   :  { %1137 = vrot.lane.b32.xlu1 %v2550_v9, %s2479_s9 }
 0x578   :  { %v728_v63 = vpop.xlane.xlu1 %727 }
 0x579   :  { %v729_v0 = vsub.f32 %v725_v60, %v728_v63 }
 0x57b   :  { %v730_v1 = vmul.f32 1.442695, %v729_v0 }
 0x57c   :  { %v890_v8 = vpop.permute.xlu1 %889 }
 0x57d   :  { %2362 = vpow2.f32 %v730_v1 }
 0x580   :  { %v888_v12 = vpop.permute.xlu1 %887 }
 0x584   :  { %v1138_v30 = vpop.permute.xlu1 %1137 }
 0x58a   :  { %v2363_v2 = vpop.eup %2362 }
 0x58b   :  { %v732_v3 = vsel %vm171_vm2, %v2363_v2, 0.0 }
 0x58c   :  { %733 = vadd.xlane.f32.xlu0 %v732_v3 }
 0x5a2   :  { %737 = vrot.lane.b32.xlu0 %v2552_v11, %s2488_s17 }
 0x615   :  { %v734_v4 = vpop.xlane.xlu0 %733 }
 0x616   :  { %2364 = vrcp.f32 %v734_v4 }
 0x619   :  { %v738_v5 = vpop.permute.xlu0 %737 }
 0x61a   :  { %2251 = vmatpush3.msra.mxu1 %v738_v5 }
 0x61b   :  { %2260 = vmatprep.subr.mxu1 %v2477_v6 }
 0x623   :  { %v2365_v7 = vpop.eup %2364 }
 0x624   :  { %v736_v10 = vmul.f32 %v2365_v7, %v2363_v2 }
 0x626   :  { %2253 = vmatmul.mubr.msk.f32.vlgmr.msra.gmra.mxu1 %vm171_vm2, %v736_v10 }
 0x627   :  { %2261 = vmatpush3.xpose.msk.msra.mxu1 %vm171_vm2, %v890_v8  ;;  %2262 = vmatprep.mubr.msk.f32.mxu1 %vm2478_vm1, %v2477_v6 }
 0x628   :  { %2270 = vmatprep.subr.mxu1 %v2477_v6 }
 0x62a   :  { %2263 = vmatmul.mubr.msk.f32.vlgmr.msra.gmra.mxu1 %vm171_vm2, %v888_v12 }
 0x62b   :  { %2272 = vmatprep.mubr.msk.f32.mxu1 %vm2478_vm1, %v2477_v6  ;;  %2271 = vmatpush3.msra.mxu1 %v2682_v36 }
 0x62c   :  { %2280 = vmatprep.subr.mxu1 %v2477_v6 }
 0x6e6   :  { %v809_v14 = vpop.f32.mrf.mxu1 }
 0x6e7   :  { %2258 = vmatmul.mubr.msk.f32.vlgmr.msra.gmra.mxu0 %vm171_vm2, %v809_v14 }
 0x6e8   :  { %v2254_v15 = vpop.f32.mrf.mxu1  ;;  %2267 = vmatprep.mubr.msk.f32.mxu0 %vm2478_vm1, %v2477_v6 }
 0x6ea   :  { %v961_v16 = vpop.f32.mrf.mxu1 }
 0x6eb   :  { %v965_v17 = vsel %vm2574_vm3, %v961_v16, -inf }
 0x6ec   :  { %v2264_v18 = vpop.f32.mrf.mxu1  ;;  %v966_v20 = vsel %vm171_vm2, %v965_v17, -inf }
 0x6ed   :  { %967 = vmax.xlane.f32.xlu0 %v966_v20 }
 0x703   :  { %977 = vrot.lane.b32.xlu0 %v2552_v11, %s2489_s18 }
 0x707   :  { %1304 = vrot.lane.b32.xlu0 %v2550_v9, %s2481_s11 }
 0x776   :  { %v968_v21 = vpop.xlane.xlu0 %967 }
 0x777   :  { %v969_v22 = vsub.f32 %v965_v17, %v968_v21 }
 0x779   :  { %v970_v23 = vmul.f32 1.442695, %v969_v22 }
 0x77a   :  { %v978_v24 = vpop.permute.xlu0 %977 }
 0x77b   :  { %2366 = vpow2.f32 %v970_v23  ;;  %2266 = vmatpush3.msra.mxu0 %v978_v24 }
 0x77c   :  { %2275 = vmatprep.subr.mxu0 %v2477_v6 }
 0x77e   :  { %v1305_v34 = vpop.permute.xlu0 %1304 }
 0x788   :  { %v2367_v25 = vpop.eup %2366 }
 0x789   :  { %v972_v26 = vsel %vm171_vm2, %v2367_v25, 0.0 }
 0x78a   :  { %973 = vadd.xlane.f32.xlu1 %v972_v26 }
 0x79b   :  { %1302 = vrot.lane.b32.xlu1 %v2661_v27, %s2480_s10 }
 0x7a7   :  { %v882_v11 = vpop.f32.mrf.mxu0 }
 0x7a8   :  { %v886_v28 = vadd.f32 %v882_v11, %v2621_v57 }
 0x7a9   :  { %v2259_v29 = vpop.f32.mrf.mxu0 }
 0x813   :  { %v974_v31 = vpop.xlane.xlu1 %973 }
 0x814   :  { %2368 = vrcp.f32 %v974_v31 }
 0x817   :  { %v1303_v35 = vpop.permute.xlu1 %1302 }
 0x821   :  { %v2369_v32 = vpop.eup %2368 }
 0x822   :  { %v976_v33 = vmul.f32 %v2369_v32, %v2367_v25 }
 0x824   :  { %2268 = vmatmul.mubr.msk.f32.vlgmr.msra.gmra.mxu0 %vm171_vm2, %v976_v33 }
 0x825   :  { %2276 = vmatpush3.xpose.msk.msra.mxu0 %vm171_vm2, %v1138_v30  ;;  %2277 = vmatprep.mubr.msk.f32.mxu0 %vm2478_vm1, %v2477_v6 }
 0x826   :  { %2285 = vmatprep.subr.mxu0 %v2477_v6 }
 0x828   :  { %2278 = vmatmul.mubr.msk.f32.vlgmr.msra.gmra.mxu0 %vm171_vm2, %v2661_v27 }
 0x829   :  { %2286 = vmatpush3.xpose.msk.msra.mxu0 %vm171_vm2, %v1305_v34  ;;  %2287 = vmatprep.mubr.msk.f32.mxu0 %vm2478_vm1, %v2477_v6 }
 0x82a   :  { %2295 = vmatprep.subr.mxu0 %v2477_v6 }
 0x82c   :  { %2288 = vmatmul.mubr.msk.f32.vlgmr.msra.gmra.mxu0 %vm171_vm2, %v1303_v35 }
 0x82d   :  { %2296 = vmatpush3.msra.mxu0 %v2605_v47  ;;  %2297 = vmatprep.mubr.msk.f32.mxu0 %vm2478_vm1, %v2477_v6 }
 0x82e   :  { %2305 = vmatprep.subr.mxu0 %v2477_v6 }
 0x8e4   :  { %v1049_v37 = vpop.f32.mrf.mxu0 }
 0x8e5   :  { %2273 = vmatmul.mubr.msk.f32.vlgmr.msra.gmra.mxu1 %vm171_vm2, %v1049_v37 }
 0x8e6   :  { %v2269_v38 = vpop.f32.mrf.mxu0  ;;  %2282 = vmatprep.mubr.msk.f32.mxu1 %vm2478_vm1, %v2477_v6 }
 0x8e8   :  { %v1210_v39 = vpop.f32.mrf.mxu0 }
 0x8e9   :  { %v1214_v40 = vsel %vm2574_vm3, %v1210_v39, -inf }
 0x8ea   :  { %v2279_v41 = vpop.f32.mrf.mxu0  ;;  %v1215_v42 = vsel %vm171_vm2, %v1214_v40, -inf }
 0x8eb   :  { %1216 = vmax.xlane.f32.xlu0 %v1215_v42 }
 0x8ec   :  { %v1376_v43 = vpop.f32.mrf.mxu0 }
 0x8ed   :  { %v1380_v44 = vsel %vm2574_vm3, %v1376_v43, -inf }
 0x8ee   :  { %v2289_v45 = vpop.f32.mrf.mxu0  ;;  %v1381_v47 = vsel %vm171_vm2, %v1380_v44, -inf }
 0x8ef   :  { %1382 = vmax.xlane.f32.xlu1 %v1381_v47 }
 0x900   :  { %1226 = vrot.lane.b32.xlu1 %v2550_v9, %s2483_s12 }
 0x904   :  { %1616 = vrot.lane.b32.xlu1 %v2550_v9, %s2484_s13 }
 0x908   :  { %1614 = vrot.lane.b32.xlu1 %v2661_v27, %s2485_s14 }
 0x974   :  { %v1217_v48 = vpop.xlane.xlu0 %1216 }
 0x975   :  { %v1218_v49 = vsub.f32 %v1214_v40, %v1217_v48 }
 0x977   :  { %v1219_v50 = vmul.f32 1.442695, %v1218_v49 }
 0x978   :  { %v1383_v51 = vpop.xlane.xlu1 %1382 }
 0x979   :  { %2370 = vpow2.f32 %v1219_v50  ;;  %v1384_v52 = vsub.f32 %v1380_v44, %v1383_v51 }
 0x97b   :  { %v1385_v53 = vmul.f32 1.442695, %v1384_v52 }
 0x97c   :  { %v1227_v54 = vpop.permute.xlu1 %1226 }
 0x97d   :  { %2372 = vpow2.f32 %v1385_v53  ;;  %2281 = vmatpush3.msra.mxu1 %v1227_v54 }
 0x97e   :  { %2290 = vmatprep.subr.mxu1 %v2477_v6 }
 0x980   :  { %v1617_v10 = vpop.permute.xlu1 %1616 }
 0x986   :  { %v2371_v55 = vpop.eup %2370 }
 0x987   :  { %v1221_v56 = vsel %vm171_vm2, %v2371_v55, 0.0 }
 0x988   :  { %1222 = vadd.xlane.f32.xlu0 %v1221_v56 }
 0x98a   :  { %v2373_v57 = vpop.eup %2372 }
 0x98b   :  { %v1387_v58 = vsel %vm171_vm2, %v2373_v57, 0.0 }
 0x98c   :  { %1388 = vadd.xlane.f32.xlu0 %v1387_v58 }
 0x9a2   :  { %1392 = vrot.lane.b32.xlu0 %v2550_v9, %s2482_s2 }
 0x9a5   :  { %v1122_v60 = vpop.f32.mrf.mxu1 }
 0x9a6   :  { %v1126_v61 = vadd.f32 %v1122_v60, %v886_v28 }
 0x9a7   :  { %v2274_v62 = vpop.f32.mrf.mxu1 }
 0x9a8   :  { %v1133_v63 = vadd.f32 %v2709_v59, %v1126_v61 }
 0x9aa   :  { %1134 = vst.msk [vmem:[#allocation8] sm:$0xff] %vm80_vm0, %v1133_v63 }
 0xa11   :  { %v1223_v0 = vpop.xlane.xlu0 %1222 }
 0xa12   :  { %2374 = vrcp.f32 %v1223_v0 }
 0xa15   :  { %v1389_v1 = vpop.xlane.xlu0 %1388 }
 0xa16   :  { %2376 = vrcp.f32 %v1389_v1 }
 0xa19   :  { %v1393_v4 = vpop.permute.xlu0 %1392 }
 0xa1f   :  { %v2375_v2 = vpop.eup %2374 }
 0xa20   :  { %v1225_v3 = vmul.f32 %v2375_v2, %v2371_v55 }
 0xa22   :  { %2283 = vmatmul.mubr.msk.f32.vlgmr.msra.gmra.mxu1 %vm171_vm2, %v1225_v3 }
 0xa23   :  { %v2377_v5 = vpop.eup %2376  ;;  %2291 = vmatpush3.msra.mxu1 %v1393_v4  ;;  %2292 = vmatprep.mubr.msk.f32.mxu1 %vm2478_vm1, %v2477_v6 }
 0xa24   :  { %v1391_v7 = vmul.f32 %v2377_v5, %v2373_v57  ;;  %2300 = vmatprep.subr.mxu1 %v2477_v6 }
 0xa26   :  { %2293 = vmatmul.mubr.msk.f32.vlgmr.msra.gmra.mxu1 %vm171_vm2, %v1391_v7 }
 0xa27   :  { %2301 = vmatpush3.msra.mxu1 %v2602_v46  ;;  %2302 = vmatprep.mubr.msk.f32.mxu1 %vm2478_vm1, %v2477_v6  ;;  %v1615_v46 = vpop.permute.xlu1 %1614 }
 0xa28   :  { %2310 = vmatprep.subr.mxu1 %v2477_v6 }
 0xae2   :  { %v1298_v8 = vpop.f32.mrf.mxu1 }
 0xae3   :  { %2303 = vmatmul.mubr.msk.f32.vlgmr.msra.gmra.mxu1 %vm171_vm2, %v1298_v8 }
 0xae4   :  { %v2284_v12 = vpop.f32.mrf.mxu1  ;;  %2312 = vmatprep.mubr.msk.f32.mxu1 %vm2478_vm1, %v2477_v6 }
 0xae6   :  { %v1464_v14 = vpop.f32.mrf.mxu1 }
 0xae7   :  { %2298 = vmatmul.mubr.msk.f32.vlgmr.msra.gmra.mxu0 %vm171_vm2, %v1464_v14 }
 0xae8   :  { %2306 = vmatpush3.xpose.msk.msra.mxu0 %vm171_vm2, %v1617_v10  ;;  %v2294_v15 = vpop.f32.mrf.mxu1  ;;  %2307 = vmatprep.mubr.msk.f32.mxu0 %vm2478_vm1, %v2477_v6 }
 0xae9   :  { %2315 = vmatprep.subr.mxu0 %v2477_v6 }
 0xaeb   :  { %2308 = vmatmul.mubr.msk.f32.vlgmr.msra.gmra.mxu0 %vm171_vm2, %v1615_v46 }
 0xaec   :  { %2316 = vmatpush3.msra.mxu0 %v2644_v13  ;;  %2317 = vmatprep.mubr.msk.f32.mxu0 %vm2478_vm1, %v2477_v6 }
 0xaed   :  { %2325 = vmatprep.subr.mxu0 %v2477_v6 }
 0xba3   :  { %v1610_v16 = vpop.f32.mrf.mxu1 }
 0xba5   :  { %v2304_v17 = vpop.f32.mrf.mxu1 }
 0xba7   :  { %v1537_v18 = vpop.f32.mrf.mxu0 }
 0xba8   :  { %v1611_v20 = vadd.f32 %v1610_v16, %v1537_v18 }
 0xba9   :  { %v2299_v21 = vpop.f32.mrf.mxu0 }
 0xbab   :  { %v1688_v22 = vpop.f32.mrf.mxu0 }
 0xbac   :  { %v1692_v23 = vsel %vm2574_vm3, %v1688_v22, -inf }
 0xbad   :  { %v2309_v24 = vpop.f32.mrf.mxu0  ;;  %v1693_v25 = vsel %vm171_vm2, %v1692_v23, -inf }
 0xbae   :  { %1694 = vmax.xlane.f32.xlu0 %v1693_v25 }
 0xbc4   :  { %1704 = vrot.lane.b32.xlu0 %v2550_v9, %s2488_s17 }
 0xbc8   :  { %1854 = vrot.lane.b32.xlu0 %v2661_v27, %s2487_s16 }
 0xc37   :  { %v1695_v13 = vpop.xlane.xlu0 %1694 }
 0xc38   :  { %v1696_v26 = vsub.f32 %v1692_v23, %v1695_v13 }
 0xc3a   :  { %v1697_v11 = vmul.f32 1.442695, %v1696_v26 }
 0xc3b   :  { %v1705_v28 = vpop.permute.xlu0 %1704 }
 0xc3c   :  { %2378 = vpow2.f32 %v1697_v11  ;;  %2311 = vmatpush3.msra.mxu1 %v1705_v28 }
 0xc3d   :  { %2320 = vmatprep.subr.mxu1 %v2477_v6 }
 0xc3f   :  { %v1855_v34 = vpop.permute.xlu0 %1854 }
 0xc49   :  { %v2379_v29 = vpop.eup %2378 }
 0xc4a   :  { %v1699_v30 = vsel %vm171_vm2, %v2379_v29, 0.0 }
 0xc4b   :  { %1700 = vadd.xlane.f32.xlu1 %v1699_v30 }
 0xc5c   :  { %1856 = vrot.lane.b32.xlu1 %v2550_v9, %s2486_s15 }
 0xcd4   :  { %v1701_v31 = vpop.xlane.xlu1 %1700 }
 0xcd5   :  { %2380 = vrcp.f32 %v1701_v31 }
 0xcd8   :  { %v1857_v27 = vpop.permute.xlu1 %1856 }
 0xce2   :  { %v2381_v32 = vpop.eup %2380 }
 0xce3   :  { %v1703_v33 = vmul.f32 %v2381_v32, %v2379_v29 }
 0xce5   :  { %2313 = vmatmul.mubr.msk.f32.vlgmr.msra.gmra.mxu1 %vm171_vm2, %v1703_v33 }
 0xce6   :  { %2321 = vmatpush3.xpose.msk.msra.mxu1 %vm171_vm2, %v1857_v27  ;;  %2322 = vmatprep.mubr.msk.f32.mxu1 %vm2478_vm1, %v2477_v6 }
 0xce7   :  { %2330 = vmatprep.subr.mxu1 %v2477_v6 }
 0xce9   :  { %2323 = vmatmul.mubr.msk.f32.vlgmr.msra.gmra.mxu1 %vm171_vm2, %v1855_v34 }
 0xcea   :  { %2331 = vmatpush3.msra.mxu1 %v2682_v36  ;;  %2332 = vmatprep.mubr.msk.f32.mxu1 %vm2478_vm1, %v2477_v6 }
 0xda5   :  { %v1776_v35 = vpop.f32.mrf.mxu1 }
 0xda6   :  { %2318 = vmatmul.mubr.msk.f32.vlgmr.msra.gmra.mxu0 %vm171_vm2, %v1776_v35 }
 0xda7   :  { %v2314_v37 = vpop.f32.mrf.mxu1  ;;  %2327 = vmatprep.mubr.msk.f32.mxu0 %vm2478_vm1, %v2477_v6 }
 0xda9   :  { %v1928_v38 = vpop.f32.mrf.mxu1 }
 0xdaa   :  { %v1932_v39 = vsel %vm2574_vm3, %v1928_v38, -inf }
 0xdab   :  { %v2324_v40 = vpop.f32.mrf.mxu1  ;;  %v1933_v41 = vsel %vm171_vm2, %v1932_v39, -inf }
 0xdac   :  { %1934 = vmax.xlane.f32.xlu1 %v1933_v41 }
 0xe35   :  { %v1935_v42 = vpop.xlane.xlu1 %1934 }
 0xe36   :  { %v1936_v36 = vsub.f32 %v1932_v39, %v1935_v42 }
 0xe38   :  { %v1937_v43 = vmul.f32 1.442695, %v1936_v36 }
 0xe3a   :  { %2382 = vpow2.f32 %v1937_v43 }
 0xe47   :  { %v2383_v44 = vpop.eup %2382 }
 0xe48   :  { %v1939_v45 = vsel %vm171_vm2, %v2383_v44, 0.0 }
 0xe49   :  { %1940 = vadd.xlane.f32.xlu0 %v1939_v45 }
 0xe5f   :  { %1944 = vrot.lane.b32.xlu0 %v2550_v9, %s2489_s18 }
 0xe66   :  { %v1849_v6 = vpop.f32.mrf.mxu0 }
 0xe67   :  { %v1853_v47 = vadd.f32 %v1849_v6, %v1611_v20 }
 0xe68   :  { %v2319_v48 = vpop.f32.mrf.mxu0 }
 0xed2   :  { %v1941_v19 = vpop.xlane.xlu0 %1940 }
 0xed3   :  { %2384 = vrcp.f32 %v1941_v19 }
 0xed6   :  { %v1945_v49 = vpop.permute.xlu0 %1944 }
 0xed7   :  { %2326 = vmatpush3.msra.mxu0 %v1945_v49 }
 0xee0   :  { %v2385_v50 = vpop.eup %2384 }
 0xee1   :  { %v1943_v51 = vmul.f32 %v2385_v50, %v2383_v44 }
 0xee3   :  { %2328 = vmatmul.mubr.msk.f32.vlgmr.msra.gmra.mxu0 %vm171_vm2, %v1943_v51 }
 0xfa3   :  { %v2016_v52 = vpop.f32.mrf.mxu0 }
 0xfa4   :  { %2333 = vmatmul.mubr.msk.f32.vlgmr.msra.gmra.mxu1 %vm171_vm2, %v2016_v52 }
 0xfa5   :  { %v2329_v53 = vpop.f32.mrf.mxu0 }
0x1064   :  { %v2089_v54 = vpop.f32.mrf.mxu1 }
0x1065   :  { %v2093_v55 = vadd.f32 %v2089_v54, %v1853_v47 }
0x1066   :  { %v2334_v9 = vpop.f32.mrf.mxu1 }
0x1067   :  { %v2094_v56 = vadd.f32 %v2709_v59, %v2093_v55 }
0x1069   :  { %2095 = vst.msk [vmem:[#allocation8 + $0x8] sm:$0xff] %vm80_vm0, %v2094_v56 }
0x106a   :  { %2457 = shalt.err (!%p2454_p5)
}
0x106b   :  { %2107 = dma.vmem_to_hbm [thread:$0]  %s2102_s21, 256, %s2779_s5, [#allocation4], %s2474_s23, %s2474_s23, %s2475_s24  }
0x106c   :  { %2470 = dma.done.wait [#allocation4], 256  }
0x106d   :  { %2471 = vsyncadd [#allocation4], 4294967040 }
0x106e   :  { %2111 = vsyncpa [#allocation3], 1 }
0x106f   :  { %2112 = vsyncpa [#allocation6], 1 }
0x1070   :  { %2113 = vsyncpa [#allocation4], 1 }

</bundles_post_ra>
